<compile_context>
chip_gen: v6e
topology: v6e:2x2x1
jax: 0.10.0
libtpu: 0.0.40
codegen_flags: <defaults>
</compile_context>

<pallas_src>
from functools import partial

import jax
import jax.numpy as jnp
from jax.experimental import pallas as pl
from jax.experimental.pallas import tpu as pltpu

INPUT_SIZE = 45
HIDDEN = 128
K_PAD = 2 * HIDDEN        # fused contraction: x padded to 128 lanes, h in next 128
FC_OUT_PAD = 128          # lane-dense FC output; real logits are the first 45 lanes
SUBLANE = 8               # f32 sublane tile


def lstm_step_fc_kernel(xh_ref, c_ref, w_gates_ref, b_gates_ref,
                        wfc_ref, bfc_ref,
                        out_ref, hnew_ref, cnew_ref):
    """Fused LSTM-cell step + Linear + Sigmoid, single MXU dot for all gates."""
    xh = xh_ref[...]            # (Bp, 256) bf16: [x | h], lane-aligned
    c = c_ref[...]              # (Bp, 128) f32

    # gates = [x|h] @ [[W_ih^T];[0];[W_hh^T]] + (b_ih + b_hh)   -> (Bp, 512) f32
    gates = jnp.dot(xh, w_gates_ref[...],
                    preferred_element_type=jnp.float32) + b_gates_ref[...]

    # PyTorch gate ordering: input, forget, cell(g), output (128-aligned slices)
    i_g = jax.nn.sigmoid(gates[:, 0 * HIDDEN:1 * HIDDEN])
    f_g = jax.nn.sigmoid(gates[:, 1 * HIDDEN:2 * HIDDEN])
    g_g = jnp.tanh(gates[:, 2 * HIDDEN:3 * HIDDEN])
    o_g = jax.nn.sigmoid(gates[:, 3 * HIDDEN:4 * HIDDEN])

    c_new = f_g * c + i_g * g_g
    h_new = o_g * jnp.tanh(c_new)

    # fc: (Bp, 128) @ (128, 128-padded) + b_fc, then sigmoid. Lane-dense store.
    logits = jnp.dot(h_new.astype(wfc_ref.dtype), wfc_ref[...],
                     preferred_element_type=jnp.float32) + bfc_ref[...]

    out_ref[...] = jax.nn.sigmoid(logits)
    hnew_ref[...] = h_new
    cnew_ref[...] = c_new


def prepare_params(params, weight_dtype=jnp.bfloat16):
    """One-time weight prep: transpose, stack, pad, fuse biases, cast to bf16."""
    w_gates = jnp.zeros((K_PAD, 4 * HIDDEN), jnp.float32)
    w_gates = w_gates.at[:INPUT_SIZE, :].set(params["w_ih"].T)   # rows [0,45)
    w_gates = w_gates.at[HIDDEN:, :].set(params["w_hh"].T)       # rows [128,256)
    b_gates = (params["b_ih"] + params["b_hh"]).reshape(1, 4 * HIDDEN)

    w_fc = jnp.zeros((HIDDEN, FC_OUT_PAD), jnp.float32)
    w_fc = w_fc.at[:, :INPUT_SIZE].set(params["w_fc"].T)
    b_fc = jnp.zeros((1, FC_OUT_PAD), jnp.float32)
    b_fc = b_fc.at[:, :INPUT_SIZE].set(params["b_fc"])

    return {
        "w_gates": w_gates.astype(weight_dtype),
        "b_gates": b_gates,                       # bias kept in f32 (exact add)
        "w_fc": w_fc.astype(weight_dtype),
        "b_fc": b_fc,
    }


@partial(jax.jit, donate_argnums=())
def lotto_predictor_forward(x, hidden, prep):
    """x: (B, 45) f32; hidden: tuple of (1, B, 128) f32; prep: prepare_params()."""
    h0, c0 = hidden
    B = x.shape[0]
    Bp = ((B + SUBLANE - 1) // SUBLANE) * SUBLANE   # pad batch to sublane tile
    h = h0.reshape(B, HIDDEN)
    c = c0.reshape(B, HIDDEN)

    # Lane-aligned fused activation [x | h]: x in lanes [0,45), h in lanes [128,256).
    xh = jnp.zeros((Bp, K_PAD), jnp.float32)
    xh = xh.at[:B, :INPUT_SIZE].set(x)
    xh = xh.at[:B, HIDDEN:].set(h)
    xh = xh.astype(prep["w_gates"].dtype)

    c_pad = jnp.zeros((Bp, HIDDEN), jnp.float32).at[:B].set(c)

    vmem = pl.BlockSpec(memory_space=pltpu.MemorySpace.VMEM)

    out, h_new, c_new = pl.pallas_call(
        lstm_step_fc_kernel,
        out_shape=(
            jax.ShapeDtypeStruct((Bp, FC_OUT_PAD), jnp.float32),
            jax.ShapeDtypeStruct((Bp, HIDDEN), jnp.float32),
            jax.ShapeDtypeStruct((Bp, HIDDEN), jnp.float32),
        ),
        in_specs=[vmem] * 6,
        out_specs=(vmem, vmem, vmem),
    )(xh, c_pad, prep["w_gates"], prep["b_gates"], prep["w_fc"], prep["b_fc"])

    out = out[:B, :INPUT_SIZE]
    return out, (h_new[:B].reshape(1, B, HIDDEN), c_new[:B].reshape(1, B, HIDDEN))


def init_params(key):
    """Deterministic init matching PyTorch default LSTM/Linear shapes (f32)."""
    k_lstm = 1.0 / jnp.sqrt(jnp.float32(HIDDEN))
    k_fc = 1.0 / jnp.sqrt(jnp.float32(HIDDEN))
    keys = jax.random.split(key, 6)
    return {
        "w_ih": jax.random.uniform(keys[0], (4 * HIDDEN, INPUT_SIZE),
                                   jnp.float32, -k_lstm, k_lstm),
        "w_hh": jax.random.uniform(keys[1], (4 * HIDDEN, HIDDEN),
                                   jnp.float32, -k_lstm, k_lstm),
        "b_ih": jax.random.uniform(keys[2], (4 * HIDDEN,),
                                   jnp.float32, -k_lstm, k_lstm),
        "b_hh": jax.random.uniform(keys[3], (4 * HIDDEN,),
                                   jnp.float32, -k_lstm, k_lstm),
        "w_fc": jax.random.uniform(keys[4], (INPUT_SIZE, HIDDEN),
                                   jnp.float32, -k_fc, k_fc),
        "b_fc": jax.random.uniform(keys[5], (INPUT_SIZE,),
                                   jnp.float32, -k_fc, k_fc),
    }


def reference_forward(x, hidden, params):
    """Pure-JAX f32 reference of the PyTorch forward, for verification."""
    h0, c0 = hidden
    B = x.shape[0]
    h, c = h0.reshape(B, HIDDEN), c0.reshape(B, HIDDEN)
    gates = (x @ params["w_ih"].T + h @ params["w_hh"].T
             + params["b_ih"] + params["b_hh"])
    i_g = jax.nn.sigmoid(gates[:, 0 * HIDDEN:1 * HIDDEN])
    f_g = jax.nn.sigmoid(gates[:, 1 * HIDDEN:2 * HIDDEN])
    g_g = jnp.tanh(gates[:, 2 * HIDDEN:3 * HIDDEN])
    o_g = jax.nn.sigmoid(gates[:, 3 * HIDDEN:4 * HIDDEN])
    c_new = f_g * c + i_g * g_g
    h_new = o_g * jnp.tanh(c_new)
    out = jax.nn.sigmoid(h_new @ params["w_fc"].T + params["b_fc"])
    return out, (h_new.reshape(1, B, HIDDEN), c_new.reshape(1, B, HIDDEN))


if __name__ == "__main__":
    key = jax.random.PRNGKey(0)
    k_param, k_x = jax.random.split(key)

    batch_size = 2
    params = init_params(k_param)
    prep = prepare_params(params)                # one-time weight prep (hoisted)

    x = jax.random.uniform(k_x, (batch_size, INPUT_SIZE), jnp.float32)
    hidden = (jnp.zeros((1, batch_size, HIDDEN), jnp.float32),
              jnp.zeros((1, batch_size, HIDDEN), jnp.float32))

    out, (h_new, c_new) = lotto_predictor_forward(x, hidden, prep)
    jax.block_until_ready((out, h_new, c_new))

    ref_out, (ref_h, ref_c) = reference_forward(x, hidden, params)
    # bf16 weights + f32 accumulation: loosened tolerance per review.
    assert jnp.allclose(out, ref_out, atol=2e-2), "output mismatch"
    assert jnp.allclose(h_new, ref_h, atol=2e-2), "h mismatch"
    assert jnp.allclose(c_new, ref_c, atol=2e-2), "c mismatch"

    print("KERNEL_OK")
</pallas_src>

<mosaic_0001>
module attributes {stable_mosaic.version = 11 : i64} {
  func.func @lstm_step_fc_kernel(%arg0: memref<8x256xbf16, #tpu.memory_space<vmem>>, %arg1: memref<8x128xf32, #tpu.memory_space<vmem>>, %arg2: memref<256x512xbf16, #tpu.memory_space<vmem>>, %arg3: memref<1x512xf32, #tpu.memory_space<vmem>>, %arg4: memref<128x128xbf16, #tpu.memory_space<vmem>>, %arg5: memref<1x128xf32, #tpu.memory_space<vmem>>, %arg6: memref<8x128xf32, #tpu.memory_space<vmem>>, %arg7: memref<8x128xf32, #tpu.memory_space<vmem>>, %arg8: memref<8x128xf32, #tpu.memory_space<vmem>>) attributes {dimension_semantics = [], scalar_prefetch = 0 : i64, scratch_operands = 0 : i64, tpu.core_type = #tpu.core_type<tc>} {
    %c0 = arith.constant 0 : index
    %c0_0 = arith.constant 0 : index
    %0 = vector.load %arg0[%c0, %c0_0] : memref<8x256xbf16, #tpu.memory_space<vmem>>, vector<8x256xbf16>
    %c0_1 = arith.constant 0 : index
    %c0_2 = arith.constant 0 : index
    %1 = vector.load %arg1[%c0_1, %c0_2] : memref<8x128xf32, #tpu.memory_space<vmem>>, vector<8x128xf32>
    %c0_3 = arith.constant 0 : index
    %c0_4 = arith.constant 0 : index
    %2 = vector.load %arg2[%c0_3, %c0_4] : memref<256x512xbf16, #tpu.memory_space<vmem>>, vector<256x512xbf16>
    %cst = arith.constant dense<0.000000e+00> : vector<8x512xf32>
    %3 = tpu.matmul %0, %2, %cst {dimension_numbers = #tpu.dot_dimension_numbers<[1], [0], [0], [1], [0, 0, 1, 1], [], []>} : vector<8x256xbf16>, vector<256x512xbf16>, vector<8x512xf32> -> vector<8x512xf32>
    %c0_5 = arith.constant 0 : index
    %c0_6 = arith.constant 0 : index
    %4 = vector.load %arg3[%c0_5, %c0_6] : memref<1x512xf32, #tpu.memory_space<vmem>>, vector<1x512xf32>
    %5 = vector.broadcast %4 : vector<1x512xf32> to vector<8x512xf32>
    %6 = arith.addf %3, %5 : vector<8x512xf32>
    %7 = vector.extract_strided_slice %6 {offsets = [0, 0], sizes = [8, 128], strides = [1, 1]} : vector<8x512xf32> to vector<8x128xf32>
    %8 = arith.negf %7 : vector<8x128xf32>
    %9 = math.exp %8 : vector<8x128xf32>
    %cst_7 = arith.constant 1.000000e+00 : f32
    %10 = vector.broadcast %cst_7 : f32 to vector<8x128xf32>
    %11 = arith.addf %10, %9 : vector<8x128xf32>
    %12 = arith.divf %10, %11 : vector<8x128xf32>
    %13 = vector.extract_strided_slice %6 {offsets = [0, 128], sizes = [8, 128], strides = [1, 1]} : vector<8x512xf32> to vector<8x128xf32>
    %14 = arith.negf %13 : vector<8x128xf32>
    %15 = math.exp %14 : vector<8x128xf32>
    %cst_8 = arith.constant 1.000000e+00 : f32
    %16 = vector.broadcast %cst_8 : f32 to vector<8x128xf32>
    %17 = arith.addf %16, %15 : vector<8x128xf32>
    %18 = arith.divf %16, %17 : vector<8x128xf32>
    %19 = vector.extract_strided_slice %6 {offsets = [0, 256], sizes = [8, 128], strides = [1, 1]} : vector<8x512xf32> to vector<8x128xf32>
    %20 = math.tanh %19 : vector<8x128xf32>
    %21 = vector.extract_strided_slice %6 {offsets = [0, 384], sizes = [8, 128], strides = [1, 1]} : vector<8x512xf32> to vector<8x128xf32>
    %22 = arith.negf %21 : vector<8x128xf32>
    %23 = math.exp %22 : vector<8x128xf32>
    %cst_9 = arith.constant 1.000000e+00 : f32
    %24 = vector.broadcast %cst_9 : f32 to vector<8x128xf32>
    %25 = arith.addf %24, %23 : vector<8x128xf32>
    %26 = arith.divf %24, %25 : vector<8x128xf32>
    %27 = arith.mulf %18, %1 : vector<8x128xf32>
    %28 = arith.mulf %12, %20 : vector<8x128xf32>
    %29 = arith.addf %27, %28 : vector<8x128xf32>
    %30 = math.tanh %29 : vector<8x128xf32>
    %31 = arith.mulf %26, %30 : vector<8x128xf32>
    %32 = arith.truncf %31 : vector<8x128xf32> to vector<8x128xbf16>
    %c0_10 = arith.constant 0 : index
    %c0_11 = arith.constant 0 : index
    %33 = vector.load %arg4[%c0_10, %c0_11] : memref<128x128xbf16, #tpu.memory_space<vmem>>, vector<128x128xbf16>
    %cst_12 = arith.constant dense<0.000000e+00> : vector<8x128xf32>
    %34 = tpu.matmul %32, %33, %cst_12 {dimension_numbers = #tpu.dot_dimension_numbers<[1], [0], [0], [1], [0, 0, 1, 1], [], []>} : vector<8x128xbf16>, vector<128x128xbf16>, vector<8x128xf32> -> vector<8x128xf32>
    %c0_13 = arith.constant 0 : index
    %c0_14 = arith.constant 0 : index
    %35 = vector.load %arg5[%c0_13, %c0_14] : memref<1x128xf32, #tpu.memory_space<vmem>>, vector<1x128xf32>
    %36 = vector.broadcast %35 : vector<1x128xf32> to vector<8x128xf32>
    %37 = arith.addf %34, %36 : vector<8x128xf32>
    %38 = arith.negf %37 : vector<8x128xf32>
    %39 = math.exp %38 : vector<8x128xf32>
    %cst_15 = arith.constant 1.000000e+00 : f32
    %40 = vector.broadcast %cst_15 : f32 to vector<8x128xf32>
    %41 = arith.addf %40, %39 : vector<8x128xf32>
    %42 = arith.divf %40, %41 : vector<8x128xf32>
    %c0_16 = arith.constant 0 : index
    %c0_17 = arith.constant 0 : index
    %43 = vector.load %arg6[%c0_16, %c0_17] : memref<8x128xf32, #tpu.memory_space<vmem>>, vector<8x128xf32>
    tpu.vector_store %arg6[%c0_16, %c0_17], %42 {strides = array<i32>} : memref<8x128xf32, #tpu.memory_space<vmem>>, vector<8x128xf32>,
    %c0_18 = arith.constant 0 : index
    %c0_19 = arith.constant 0 : index
    %44 = vector.load %arg7[%c0_18, %c0_19] : memref<8x128xf32, #tpu.memory_space<vmem>>, vector<8x128xf32>
    tpu.vector_store %arg7[%c0_18, %c0_19], %31 {strides = array<i32>} : memref<8x128xf32, #tpu.memory_space<vmem>>, vector<8x128xf32>,
    %c0_20 = arith.constant 0 : index
    %c0_21 = arith.constant 0 : index
    %45 = vector.load %arg8[%c0_20, %c0_21] : memref<8x128xf32, #tpu.memory_space<vmem>>, vector<8x128xf32>
    tpu.vector_store %arg8[%c0_20, %c0_21], %29 {strides = array<i32>} : memref<8x128xf32, #tpu.memory_space<vmem>>, vector<8x128xf32>,
    return
  }
}

</mosaic_0001>

<bundles_post_ra>
// kernel: lotto_predictor_forward.1
= control target key start
LH: loop header
LB: loop body
LE: loop exit
PB: predicated region body
PF: predicated region fallthrough
CT: control target
= control target key end

     0   :  { %14 = vsyncpa [#allocation3], 0  ;;  %s1077_s0 = inlined_call_operand.vmem [shape: bf16[8,256], index: 0, kind: input, shape index: {}]   ;;  %s1078_s1 = inlined_call_operand.vmem [shape: f32[8,128], index: 1, kind: input, shape index: {}]   ;;  %s1079_s2 = inlined_call_operand.hbm [shape: bf16[256,512], index: 2, kind: input, shape index: {}]   ;;  %s1080_s3 = inlined_call_operand.vmem [shape: f32[1,512], index: 3, kind: input, shape index: {}]   ;;  %s1081_s4 = inlined_call_operand.hbm [shape: bf16[128,128], index: 4, kind: input, shape index: {}]   ;;  %s1082_s5 = inlined_call_operand.vmem [shape: f32[1,128], index: 5, kind: input, shape index: {}]   ;;  %s1083_s6 = inlined_call_operand.vmem [shape: f32[8,128], index: 6, kind: output, shape index: {0}]   ;;  %s1084_s7 = inlined_call_operand.vmem [shape: f32[8,128], index: 7, kind: output, shape index: {1}]   ;;  %s1085_s8 = inlined_call_operand.vmem [shape: f32[8,128], index: 8, kind: output, shape index: {2}]  }
   0x1   :  { %15 = vsyncpa [#allocation5], 0  ;;  %s997_s27 = smov [#allocation2]  }
   0x2   :  { %s25_s28 = sshll.u32 %s997_s27, 4  ;;  %s26_s28 = int_to_ptr.vmem [resolvable:$true] %s25_s28 }
   0x3   :  { %s961_s29 = scalar_lea.vmem %s26_s28, 8192  ;;  %p966_p1 = scmp.lt.s32.totalorder %s26_s28, %s26_s28 }
   0x4   :  { %p962_p0 = scmp.ne.s32.totalorder %s26_s28, %s961_s29  ;;  %p967_p2 = scmp.lt.s32.totalorder %s961_s29, %s961_s29 }
   0x6   :  { %p968_p3 = por %p967_p2, %p966_p1 }
   0x8   :  { %p969_p4 = pnand %p968_p3, %p962_p0 }
   0xa   :  { %972 = shalt.err (!%p969_p4)
}
   0xb   :  { %s998_s30 = smov 256   ;;  %s999_s9 = smov 16  }
   0xc   :  { %31 = dma.hbm_to_vmem [thread:$0]  %s1079_s2, 8192, %s26_s28, [#allocation3], %s998_s30, %s998_s30, %s999_s9  }
   0xd   :  { %s1000_s12 = smov [#allocation4]  }
   0xe   :  { %s39_s13 = sshll.u32 %s1000_s12, 4  ;;  %s40_s13 = int_to_ptr.vmem [resolvable:$true] %s39_s13 }
   0xf   :  { %s981_s14 = scalar_lea.vmem %s40_s13, 1024  ;;  %p986_p6 = scmp.lt.s32.totalorder %s40_s13, %s40_s13 }
  0x10   :  { %p982_p5 = scmp.ne.s32.totalorder %s40_s13, %s981_s14  ;;  %p987_p7 = scmp.lt.s32.totalorder %s981_s14, %s981_s14 }
  0x12   :  { %p988_p8 = por %p987_p7, %p986_p6 }
  0x14   :  { %p989_p9 = pnand %p988_p8, %p982_p5 }
  0x16   :  { %992 = shalt.err (!%p989_p9)
}
  0x17   :  { %s1001_s15 = smov 64   ;;  %s1002_s16 = smov 4  }
  0x18   :  { %45 = dma.hbm_to_vmem [thread:$0]  %s1081_s4, 1024, %s40_s13, [#allocation5], %s1001_s15, %s1001_s15, %s1002_s16  }
  0x19   :  { %993 = dma.done.wait [#allocation3], 8192  }
  0x1a   :  { %994 = vsyncadd [#allocation3], 4294959104 }
  0x1b   :  { %995 = dma.done.wait [#allocation5], 1024  }
  0x1c   :  { %996 = vsyncadd [#allocation5], 4294966272  ;;  %v827_v0 = vld [vmem:[#allocation2 + $0xe4] ss:$16 sps:$4 sm:$0xff]   ;;  %v829_v1 = vld [vmem:[#allocation2 + $0xe0] ss:$16 sps:$4 sm:$0xff]  }
  0x1d   :  { %470 = vmatprep.subr.bf16.mxu0 %v827_v0  ;;  %v830_v2 = vld [vmem:[#allocation2 + $0xc4] ss:$16 sps:$4 sm:$0xff]   ;;  %v832_v3 = vld [vmem:[#allocation2 + $0xc0] ss:$16 sps:$4 sm:$0xff]   ;;  %v838_v5 = vld [vmem:[#allocation2 + $0xec] ss:$16 sps:$4 sm:$0xff]  }
  0x1e   :  { %471 = vmatpush1.bf16.msra.mxu0 %v829_v1  ;;  %v833_v4 = vld [vmem:[#allocation2 + $0xa4] ss:$16 sps:$4 sm:$0xff]   ;;  %v841_v6 = vld [vmem:[#allocation2 + $0xe8] ss:$16 sps:$4 sm:$0xff]   ;;  %v835_v7 = vld [vmem:[#allocation2 + $0xa0] ss:$16 sps:$4 sm:$0xff]   ;;  %511 = vmatprep.subr.bf16.mxu1 %v838_v5 }
  0x1f   :  { %472 = vmatprep.subr.bf16.mxu0 %v830_v2  ;;  %v836_v8 = vld [vmem:[#allocation2 + $0x84] ss:$16 sps:$4 sm:$0xff]   ;;  %512 = vmatpush1.bf16.msra.mxu1 %v841_v6  ;;  %v844_v9 = vld [vmem:[#allocation2 + $0xcc] ss:$16 sps:$4 sm:$0xff]   ;;  %v847_v10 = vld [vmem:[#allocation2 + $0xc8] ss:$16 sps:$4 sm:$0xff]  }
  0x20   :  { %513 = vmatprep.subr.bf16.mxu1 %v844_v9  ;;  %v840_v11 = vld [vmem:[#allocation2 + $0x80] ss:$16 sps:$4 sm:$0xff]   ;;  %v842_v12 = vld [vmem:[#allocation2 + $0x64] ss:$16 sps:$4 sm:$0xff]   ;;  %v850_v13 = vld [vmem:[#allocation2 + $0xac] ss:$16 sps:$4 sm:$0xff]  }
  0x21   :  { %v853_v14 = vld [vmem:[#allocation2 + $0xa8] ss:$16 sps:$4 sm:$0xff]   ;;  %v856_v15 = vld [vmem:[#allocation2 + $0x8c] ss:$16 sps:$4 sm:$0xff]   ;;  %v846_v16 = vld [vmem:[#allocation2 + $0x60] ss:$16 sps:$4 sm:$0xff]  }
  0x22   :  { %473 = vmatpush1.bf16.msra.mxu0 %v832_v3  ;;  %v848_v17 = vld [vmem:[#allocation2 + $0x44] ss:$16 sps:$4 sm:$0xff]   ;;  %v859_v18 = vld [vmem:[#allocation2 + $0x88] ss:$16 sps:$4 sm:$0xff]   ;;  %v862_v19 = vld [vmem:[#allocation2 + $0x6c] ss:$16 sps:$4 sm:$0xff]  }
  0x23   :  { %474 = vmatprep.subr.bf16.mxu0 %v833_v4  ;;  %514 = vmatpush1.bf16.msra.mxu1 %v847_v10  ;;  %v852_v20 = vld [vmem:[#allocation2 + $0x40] ss:$16 sps:$4 sm:$0xff]   ;;  %v854_v21 = vld [vmem:[#allocation2 + $0x24] ss:$16 sps:$4 sm:$0xff]   ;;  %v865_v22 = vld [vmem:[#allocation2 + $0x68] ss:$16 sps:$4 sm:$0xff]  }
  0x24   :  { %515 = vmatprep.subr.bf16.mxu1 %v850_v13  ;;  %v868_v23 = vld [vmem:[#allocation2 + $0x4c] ss:$16 sps:$4 sm:$0xff]   ;;  %v858_v24 = vld [vmem:[#allocation2 + $0x20] ss:$16 sps:$4 sm:$0xff]   ;;  %v860_v25 = vld [vmem:[#allocation2 + $0x4] ss:$16 sps:$4 sm:$0xff]  }
  0x25   :  { %v871_v26 = vld [vmem:[#allocation2 + $0x48] ss:$16 sps:$4 sm:$0xff]   ;;  %v874_v27 = vld [vmem:[#allocation2 + $0x2c] ss:$16 sps:$4 sm:$0xff]   ;;  %v864_v28 = vld [vmem:[#allocation2] ss:$16 sps:$4 sm:$0xff]  }
  0x26   :  { %475 = vmatpush1.bf16.msra.mxu0 %v835_v7  ;;  %v866_v29 = vld [vmem:[#allocation2 + $0x1e4] ss:$16 sps:$4 sm:$0xff]   ;;  %v877_v30 = vld [vmem:[#allocation2 + $0x28] ss:$16 sps:$4 sm:$0xff]   ;;  %v880_v31 = vld [vmem:[#allocation2 + $0xc] ss:$16 sps:$4 sm:$0xff]  }
  0x27   :  { %476 = vmatprep.subr.bf16.mxu0 %v836_v8  ;;  %516 = vmatpush1.bf16.msra.mxu1 %v853_v14  ;;  %v870_v32 = vld [vmem:[#allocation2 + $0x1e0] ss:$16 sps:$4 sm:$0xff]   ;;  %v872_v33 = vld [vmem:[#allocation2 + $0x1c4] ss:$16 sps:$4 sm:$0xff]   ;;  %v883_v34 = vld [vmem:[#allocation2 + $0x8] ss:$16 sps:$4 sm:$0xff]  }
  0x28   :  { %517 = vmatprep.subr.bf16.mxu1 %v856_v15  ;;  %v886_v35 = vld [vmem:[#allocation2 + $0x1ec] ss:$16 sps:$4 sm:$0xff]   ;;  %v876_v36 = vld [vmem:[#allocation2 + $0x1c0] ss:$16 sps:$4 sm:$0xff]   ;;  %v878_v37 = vld [vmem:[#allocation2 + $0x1a4] ss:$16 sps:$4 sm:$0xff]  }
  0x29   :  { %v889_v38 = vld [vmem:[#allocation2 + $0x1e8] ss:$16 sps:$4 sm:$0xff]   ;;  %v892_v39 = vld [vmem:[#allocation2 + $0x1cc] ss:$16 sps:$4 sm:$0xff]   ;;  %v882_v40 = vld [vmem:[#allocation2 + $0x1a0] ss:$16 sps:$4 sm:$0xff]  }
  0x2a   :  { %477 = vmatpush1.bf16.msra.mxu0 %v840_v11  ;;  %v55_v41 = vld [vmem:[%s1077_s0] sm:$0xff]  ;;  %v895_v44 = vld [vmem:[#allocation2 + $0x1c8] ss:$16 sps:$4 sm:$0xff]   ;;  %v898_v46 = vld [vmem:[#allocation2 + $0x1ac] ss:$16 sps:$4 sm:$0xff]   ;;  %v1003_v4 = vmov 0.0  }
  0x2b   :  { %478 = vmatprep.subr.bf16.mxu0 %v842_v12  ;;  %518 = vmatpush1.bf16.msra.mxu1 %v859_v18  ;;  %v884_v42 = vld [vmem:[#allocation2 + $0x184] ss:$16 sps:$4 sm:$0xff]   ;;  %v712_v43 = vcombine.high %v55_v41, %v55_v41  ;;  %v888_v45 = vld [vmem:[#allocation2 + $0x180] ss:$16 sps:$4 sm:$0xff]   ;;  %v901_v48 = vld [vmem:[#allocation2 + $0x1a8] ss:$16 sps:$4 sm:$0xff]   ;;  %v711_v1 = vcombine.low %v55_v41, %v55_v41  ;;  %v123_v12 = vlaneseq }
  0x2c   :  { %519 = vmatprep.subr.bf16.mxu1 %v862_v19  ;;  %v890_v47 = vld [vmem:[#allocation2 + $0x164] ss:$16 sps:$4 sm:$0xff]   ;;  %v904_v49 = vld [vmem:[#allocation2 + $0x18c] ss:$16 sps:$4 sm:$0xff]   ;;  %v894_v50 = vld [vmem:[#allocation2 + $0x160] ss:$16 sps:$4 sm:$0xff]  }
  0x2d   :  { %502 = vmatprep.mubr.bf16.mxu0 %v712_v43  ;;  %543 = vmatprep.mubr.bf16.mxu1 %v712_v43  ;;  %v896_v51 = vld [vmem:[#allocation2 + $0x144] ss:$16 sps:$4 sm:$0xff]   ;;  %v907_v52 = vld [vmem:[#allocation2 + $0x188] ss:$16 sps:$4 sm:$0xff]   ;;  %v910_v53 = vld [vmem:[#allocation2 + $0x16c] ss:$16 sps:$4 sm:$0xff]  }
  0x2e   :  { %479 = vmatpush1.bf16.msra.mxu0 %v846_v16  ;;  %v900_v54 = vld [vmem:[#allocation2 + $0x140] ss:$16 sps:$4 sm:$0xff]   ;;  %v902_v55 = vld [vmem:[#allocation2 + $0x124] ss:$16 sps:$4 sm:$0xff]   ;;  %v913_v56 = vld [vmem:[#allocation2 + $0x168] ss:$16 sps:$4 sm:$0xff]  }
  0x2f   :  { %480 = vmatprep.subr.bf16.mxu0 %v848_v17  ;;  %520 = vmatpush1.bf16.msra.mxu1 %v865_v22  ;;  %v916_v57 = vld [vmem:[#allocation2 + $0x14c] ss:$16 sps:$4 sm:$0xff]   ;;  %v906_v58 = vld [vmem:[#allocation2 + $0x120] ss:$16 sps:$4 sm:$0xff]   ;;  %v908_v59 = vld [vmem:[#allocation2 + $0x104] ss:$16 sps:$4 sm:$0xff]  }
  0x30   :  { %521 = vmatprep.subr.bf16.mxu1 %v868_v23  ;;  %v918_v60 = vld [vmem:[#allocation2 + $0x148] ss:$16 sps:$4 sm:$0xff]   ;;  %v919_v61 = vld [vmem:[#allocation2 + $0x12c] ss:$16 sps:$4 sm:$0xff]   ;;  %v912_v62 = vld [vmem:[#allocation2 + $0x100] ss:$16 sps:$4 sm:$0xff]  }
  0x31   :  { %v921_v63 = vld [vmem:[#allocation2 + $0x128] ss:$16 sps:$4 sm:$0xff]   ;;  %v922_v0 = vld [vmem:[#allocation2 + $0x10c] ss:$16 sps:$4 sm:$0xff]   ;;  %v926_v5 = vld [vmem:[#allocation4 + $0x30] sm:$0xff]   ;;  %vm1004_vm0 = vmmov 0  }
  0x32   :  { %481 = vmatpush1.bf16.msra.mxu0 %v852_v20  ;;  %v924_v2 = vld [vmem:[#allocation2 + $0x108] ss:$16 sps:$4 sm:$0xff]   ;;  %v928_v7 = vld [vmem:[#allocation4 + $0x20] sm:$0xff]   ;;  %v930_v9 = vld [vmem:[#allocation4 + $0x10] sm:$0xff]   ;;  %v124_v13 = vshrl.u32 %v123_v12, 7 }
  0x33   :  { %482 = vmatprep.subr.bf16.mxu0 %v854_v21  ;;  %522 = vmatpush1.bf16.msra.mxu1 %v871_v26  ;;  %v925_v3 = vld [vmem:[#allocation4 + $0x38] sm:$0xff]   ;;  %v927_v6 = vld [vmem:[#allocation4 + $0x28] sm:$0xff]   ;;  %v932_v11 = vld [vmem:[#allocation4] sm:$0xff]  }
  0x34   :  { %523 = vmatprep.subr.bf16.mxu1 %v874_v27  ;;  %v929_v8 = vld [vmem:[#allocation4 + $0x18] sm:$0xff]   ;;  %v931_v10 = vld [vmem:[#allocation4 + $0x8] sm:$0xff]   ;;  %v125_v14 = vsub.s32 0, %v124_v13  ;;  %v121_v15 = vld [vmem:[%s1080_s3] sm:$0xf]  ;;  %v129_v16 = vsub.s32 1, %v124_v13 }
  0x36   :  { %483 = vmatpush1.bf16.msra.mxu0 %v858_v24  ;;  %v126_v17 = vrot.slane %v121_v15, %v125_v14  ;;  %v130_v18 = vrot.slane %v121_v15, %v129_v16 }
  0x37   :  { %484 = vmatprep.subr.bf16.mxu0 %v860_v25  ;;  %524 = vmatpush1.bf16.msra.mxu1 %v877_v30  ;;  %v137_v25 = vsub.s32 3, %v124_v13 }
  0x38   :  { %525 = vmatprep.subr.bf16.mxu1 %v880_v31 }
  0x39   :  { %v138_v31 = vrot.slane %v121_v15, %v137_v25 }
  0x3a   :  { %485 = vmatpush1.bf16.msra.mxu0 %v864_v28 }
  0x3b   :  { %486 = vmatprep.subr.bf16.mxu0 %v866_v29  ;;  %526 = vmatpush1.bf16.msra.mxu1 %v883_v34  ;;  %v133_v29 = vsub.s32 2, %v124_v13 }
  0x3c   :  { %527 = vmatprep.subr.bf16.mxu1 %v886_v35 }
  0x3e   :  { %487 = vmatpush2.bf16.msra.mxu0 %v870_v32 }
  0x3f   :  { %488 = vmatprep.subr.bf16.mxu0 %v872_v33  ;;  %528 = vmatpush2.bf16.msra.mxu1 %v889_v38  ;;  %v134_v33 = vrot.slane %v121_v15, %v133_v29 }
  0x40   :  { %529 = vmatprep.subr.bf16.mxu1 %v892_v39 }
  0x42   :  { %489 = vmatpush2.bf16.msra.mxu0 %v876_v36 }
  0x43   :  { %490 = vmatprep.subr.bf16.mxu0 %v878_v37  ;;  %530 = vmatpush2.bf16.msra.mxu1 %v895_v44 }
  0x44   :  { %531 = vmatprep.subr.bf16.mxu1 %v898_v46 }
  0x46   :  { %491 = vmatpush2.bf16.msra.mxu0 %v882_v40 }
  0x47   :  { %492 = vmatprep.subr.bf16.mxu0 %v884_v42  ;;  %532 = vmatpush2.bf16.msra.mxu1 %v901_v48 }
  0x48   :  { %533 = vmatprep.subr.bf16.mxu1 %v904_v49 }
  0x4a   :  { %493 = vmatpush2.bf16.msra.mxu0 %v888_v45  ;;  %v56_v45 = vld [vmem:[%s1078_s1] sm:$0xff] }
  0x4b   :  { %494 = vmatprep.subr.bf16.mxu0 %v890_v47  ;;  %534 = vmatpush2.bf16.msra.mxu1 %v907_v52 }
  0x4c   :  { %535 = vmatprep.subr.bf16.mxu1 %v910_v53 }
  0x4e   :  { %495 = vmatpush2.bf16.msra.mxu0 %v894_v50 }
  0x4f   :  { %496 = vmatprep.subr.bf16.mxu0 %v896_v51  ;;  %536 = vmatpush2.bf16.msra.mxu1 %v913_v56 }
  0x50   :  { %537 = vmatprep.subr.bf16.mxu1 %v916_v57 }
  0x52   :  { %497 = vmatpush2.bf16.msra.mxu0 %v900_v54 }
  0x53   :  { %498 = vmatprep.subr.bf16.mxu0 %v902_v55  ;;  %538 = vmatpush2.bf16.msra.mxu1 %v918_v60  ;;  %v780_v55 = vld [vmem:[%s1082_s5] ss:$0 sm:$0xff] }
  0x54   :  { %539 = vmatprep.subr.bf16.mxu1 %v919_v61 }
  0x56   :  { %499 = vmatpush2.bf16.msra.mxu0 %v906_v58 }
  0x57   :  { %500 = vmatprep.subr.bf16.mxu0 %v908_v59  ;;  %540 = vmatpush2.bf16.msra.mxu1 %v921_v63 }
  0x58   :  { %541 = vmatprep.subr.bf16.mxu1 %v922_v0 }
  0x5a   :  { %501 = vmatpush2.bf16.msra.mxu0 %v912_v62 }
  0x5b   :  { %542 = vmatpush2.bf16.msra.mxu1 %v924_v2  ;;  %799 = vmatprep.subr.bf16.mxu0 %v1003_v4 }
  0x5d   :  { %503 = vmatmul.mubr.bf16.vlgmr.msra.gmra.mxu0 %v711_v1 }
  0x5e   :  { %544 = vmatmul.mubr.bf16.vlgmr.msra.gmra.mxu1 %v711_v1  ;;  %800 = vmatpush3.bf16.msra.mxu0 %v925_v3 }
  0x5f   :  { %801 = vmatprep.subr.bf16.mxu0 %v1003_v4  ;;  %815 = vmatprep.mubr.msk.bf16.mxu0 %vm1004_vm0, %v1003_v4 }
  0x62   :  { %802 = vmatpush3.bf16.msra.mxu0 %v926_v5 }
  0x63   :  { %803 = vmatprep.subr.bf16.mxu0 %v1003_v4 }
  0x66   :  { %804 = vmatpush3.bf16.msra.mxu0 %v927_v6 }
  0x67   :  { %805 = vmatprep.subr.bf16.mxu0 %v1003_v4 }
  0x6a   :  { %806 = vmatpush3.bf16.msra.mxu0 %v928_v7 }
  0x6b   :  { %807 = vmatprep.subr.bf16.mxu0 %v1003_v4 }
  0x6e   :  { %808 = vmatpush3.bf16.msra.mxu0 %v929_v8 }
  0x6f   :  { %809 = vmatprep.subr.bf16.mxu0 %v1003_v4 }
  0x72   :  { %810 = vmatpush3.bf16.msra.mxu0 %v930_v9 }
  0x73   :  { %811 = vmatprep.subr.bf16.mxu0 %v1003_v4 }
  0x76   :  { %812 = vmatpush3.bf16.msra.mxu0 %v931_v10 }
  0x77   :  { %813 = vmatprep.subr.bf16.mxu0 %v1003_v4 }
  0x7a   :  { %814 = vmatpush3.bf16.msra.mxu0 %v932_v11 }
 0x11d   :  { %v504_v19 = vpop.f32.mrf.mxu0 }
 0x11e   :  { %v505_v20 = vadd.f32 %v504_v19, %v126_v17  ;;  %v545_v27 = vpop.f32.mrf.mxu1 }
 0x11f   :  { %v506_v21 = vpop.f32.mrf.mxu0  ;;  %v546_v36 = vadd.f32 %v545_v27, %v134_v33 }
 0x120   :  { %v777_v22 = vmul.f32 -1.442695, %v505_v20  ;;  %v507_v23 = vadd.f32 %v506_v21, %v130_v18  ;;  %v547_v30 = vpop.f32.mrf.mxu1 }
 0x121   :  { %v508_v24 = vpop.f32.mrf.mxu0  ;;  %v548_v35 = vadd.f32 %v547_v30, %v138_v31 }
 0x122   :  { %933 = vpow2.f32 %v777_v22  ;;  %v778_v26 = vmul.f32 -1.442695, %v507_v23  ;;  %v549_v32 = vpop.f32.mrf.mxu1 }
 0x123   :  { %v509_v28 = vpop.f32.mrf.mxu0  ;;  %v779_v37 = vmul.f32 -1.442695, %v548_v35 }
 0x124   :  { %935 = vpow2.f32 %v778_v26  ;;  %v550_v34 = vpop.f32.mrf.mxu1 }
 0x125   :  { %937 = vtanh.f32 %v546_v36 }
 0x126   :  { %939 = vpow2.f32 %v779_v37 }
 0x12f   :  { %v934_v38 = vpop.eup %933 }
 0x130   :  { %v555_v39 = vadd.f32 1.0, %v934_v38 }
 0x131   :  { %v936_v40 = vpop.eup %935 }
 0x132   :  { %941 = vrcp.f32 %v555_v39  ;;  %v561_v41 = vadd.f32 1.0, %v936_v40  ;;  %v938_v42 = vpop.eup %937 }
 0x133   :  { %v940_v43 = vpop.eup %939 }
 0x134   :  { %943 = vrcp.f32 %v561_v41  ;;  %v568_v47 = vadd.f32 1.0, %v940_v43 }
 0x136   :  { %945 = vrcp.f32 %v568_v47 }
 0x13f   :  { %v942_v44 = vpop.eup %941 }
 0x140   :  { %v572_v49 = vmul.f32 %v942_v44, %v938_v42 }
 0x141   :  { %v944_v46 = vpop.eup %943 }
 0x142   :  { %v571_v48 = vmul.f32 %v944_v46, %v56_v45 }
 0x143   :  { %v946_v51 = vpop.eup %945 }
 0x144   :  { %v573_v50 = vadd.f32 %v572_v49, %v571_v48 }
 0x146   :  { %947 = vtanh.f32 %v573_v50  ;;  %696 = vst [vmem:[%s1085_s8] sm:$0xff] %v573_v50 }
 0x153   :  { %v948_v52 = vpop.eup %947 }
 0x154   :  { %v575_v53 = vmul.f32 %v948_v52, %v946_v51 }
 0x156   :  { %v576_v54 = vpack.c.bf16 %v575_v53, %v575_v53  ;;  %695 = vst [vmem:[%s1084_s7] sm:$0xff] %v575_v53 }
 0x158   :  { %816 = vmatmul.mubr.bf16.vlgmr.msra.gmra.mxu0 %v576_v54 }
 0x218   :  { %v682_v56 = vpop.f32.mrf.mxu0 }
 0x219   :  { %v683_v57 = vadd.f32 %v780_v55, %v682_v56 }
 0x21a   :  { %v817_v58 = vpop.f32.mrf.mxu0 }
 0x21b   :  { %v789_v59 = vmul.f32 -1.442695, %v683_v57 }
 0x21c   :  { %v685_v60 = vpop.f32.mrf.mxu0 }
 0x21d   :  { %949 = vpow2.f32 %v789_v59 }
 0x21e   :  { %v818_v61 = vpop.f32.mrf.mxu0 }
 0x22a   :  { %v950_v62 = vpop.eup %949 }
 0x22b   :  { %v691_v63 = vadd.f32 1.0, %v950_v62 }
 0x22d   :  { %951 = vrcp.f32 %v691_v63 }
 0x23a   :  { %v952_v0 = vpop.eup %951 }
 0x23b   :  { %694 = vst [vmem:[%s1083_s6] sm:$0xff] %v952_v0 }
 0x23c   :  { %709 = vsyncpa [#allocation3], 1 }
 0x23d   :  { %710 = vsyncpa [#allocation5], 1 }

</bundles_post_ra>
